<compile_context>
chip_gen: v7x
topology: tpu7x:2x2x1
jax: 0.10.0
libtpu: 0.0.40
codegen_flags: <defaults>
</compile_context>

<pallas_src>
import math
from functools import partial

import jax
import jax.numpy as jnp
from jax.experimental import pallas as pl
from jax.experimental.pallas import tpu as pltpu


def _round_up(x, m):
    return (x + m - 1) // m * m


def _adaptive_linear_kernel(idx_ref, x_ref, w_ref, b_ref, o_ref):
    # idx_ref: scalar-prefetch channel indices (SMEM); used only by index_maps.
    # Per grid step (leading size-1 dims squeezed via None block dims):
    #   x_ref: (tN, In)    input dtype (f32); cast in-kernel to compute dtype
    #   w_ref: (In, tOut)  compute dtype (bf16 by default), gathered channel tile
    #   b_ref: (1, tOut)   f32, gathered channel bias tile
    #   o_ref: (tN, tOut)  output dtype
    x = x_ref[...].astype(w_ref.dtype)  # in-register cast: no extra HBM pass over x
    acc = jnp.dot(x, w_ref[...], preferred_element_type=jnp.float32)
    o_ref[...] = (acc + b_ref[...]).astype(o_ref.dtype)


def prepare_params(weight, bias, compute_dtype=jnp.bfloat16):
    """One-time (per model) preparation, hoisted out of the per-call path.

    Casts weight to the compute dtype (bf16 by default; pass jnp.float32 for a
    full-precision validation path) and pads the output dim of weight/bias to a
    lane-dense multiple of 128 so the kernel's output stores are unmasked.
    Returns (w_prep, b_prep, out_size).
    """
    C, In, Out = weight.shape
    assert bias.shape == (C, 1, Out)
    OutP = _round_up(Out, 128)
    w = weight.astype(compute_dtype)
    b = bias.astype(jnp.float32)
    if OutP != Out:
        w = jnp.pad(w, ((0, 0), (0, 0), (0, OutP - Out)))
        b = jnp.pad(b, ((0, 0), (0, 0), (0, OutP - Out)))
    return w, b, Out


def _choose_tiles(N, In, OutP, x_bytes, w_bytes, out_bytes,
                  budget_bytes=40 << 20):
    """Pick (tN, tOut) maximizing tile size under a double-buffered VMEM budget
    that is safe on all generations (v7x has only 64 MiB VMEM per TC)."""
    # N tile: sublane-aligned (x is f32 in HBM -> 8-row layout unit), capped at
    # 512 (measured mem-bound kernels reach ~85% of HBM roofline at 512 tiles).
    tN = min(512, _round_up(N, 8))
    # Out tile: prefer the full padded width (removes the out-tile grid axis ->
    # x[b] is DMA'd exactly once and the weight block index depends only on
    # idx[b]); otherwise the largest lane-dense tile dividing OutP.
    cands = [OutP] + [t for t in (1024, 512, 256, 128) if t < OutP and OutP % t == 0]
    for tOut in cands:
        fp = 2 * (tN * In * x_bytes + In * tOut * w_bytes + tOut * 4
                  + tN * tOut * out_bytes)
        if fp <= budget_bytes:
            return tN, tOut, fp
    tOut = 128  # fallback for extremely large In (see TODO on K-tiling)
    fp = 2 * (tN * In * x_bytes + In * tOut * w_bytes + tOut * 4
              + tN * tOut * out_bytes)
    return tN, tOut, fp


@partial(jax.jit, static_argnames=("out_size",))
def adaptive_linear_forward(x, w_prep, b_prep, indices, out_size):
    """bmm(x, weight[indices]) + bias[indices].

    x: (B, N, In) float32; w_prep/b_prep from `prepare_params`;
    indices: (B,) int channel ids.
    """
    B, N, In = x.shape
    C, In_w, OutP = w_prep.shape
    assert In_w == In
    assert b_prep.shape == (C, 1, OutP)
    assert indices.shape == (B,)
    out_dtype = x.dtype

    x_bytes = jnp.dtype(x.dtype).itemsize
    w_bytes = jnp.dtype(w_prep.dtype).itemsize
    out_bytes = jnp.dtype(out_dtype).itemsize
    tN, tOut, footprint = _choose_tiles(N, In, OutP, x_bytes, w_bytes, out_bytes)
    n_n = pl.cdiv(N, tN)          # ragged last N tile handled by Pallas (masked writeback)
    n_out = OutP // tOut

    # Out-of-range channel ids would feed the weight/bias index_maps directly
    # and DMA the wrong (or out-of-bounds) channel -> clamp defensively.
    idx = jnp.clip(indices.astype(jnp.int32), 0, C - 1)

    # Grid order (B, out-tiles, N-tiles): N-tile axis innermost so the gathered
    # (In, tOut) weight tile and the (1, tOut) bias tile keep the same block
    # index across the inner loop (Pallas skips the re-DMA).
    grid_spec = pltpu.PrefetchScalarGridSpec(
        num_scalar_prefetch=1,
        grid=(B, n_out, n_n),
        in_specs=[
            # x: one (tN, In) slab per (b, i); stays f32, cast in-kernel.
            pl.BlockSpec((None, tN, In), lambda b, j, i, idx_ref: (b, i, 0)),
            # weight: channel gathered via prefetched indices.
            pl.BlockSpec((None, In, tOut), lambda b, j, i, idx_ref: (idx_ref[b], 0, j)),
            # bias: gathered in-kernel with the same channel index.
            pl.BlockSpec((None, 1, tOut), lambda b, j, i, idx_ref: (idx_ref[b], 0, j)),
        ],
        out_specs=pl.BlockSpec((None, tN, tOut), lambda b, j, i, idx_ref: (b, i, j)),
    )

    # Raise the scoped-VMEM limit past the small defaults (v5e: 16 MiB) but stay
    # comfortably under v7x's 64 MiB physical VMEM.
    vmem_limit = int(min(56 << 20, max(32 << 20, footprint + (8 << 20))))

    out = pl.pallas_call(
        _adaptive_linear_kernel,
        out_shape=jax.ShapeDtypeStruct((B, N, OutP), out_dtype),
        grid_spec=grid_spec,
        compiler_params=pltpu.CompilerParams(
            # Every grid step writes a disjoint output block, no carried state.
            dimension_semantics=("parallel", "parallel", "parallel"),
            vmem_limit_bytes=vmem_limit),
    )(idx, x, w_prep, b_prep)

    if OutP != out_size:
        out = out[:, :, :out_size]
    return out


def init_params(key, channel_size, input_size, output_size):
    """Parameter init mirroring the PyTorch module.

    torch.nn.init.kaiming_uniform_ on a 3-D tensor (C, In, Out):
      fan_in = In * Out, gain = sqrt(2) (a=0),
      bound = gain * sqrt(3 / fan_in); weights ~ U(-bound, bound).
    Bias is zero-initialized.
    """
    fan_in = input_size * output_size
    bound = math.sqrt(2.0) * math.sqrt(3.0 / fan_in)
    weight = jax.random.uniform(
        key, (channel_size, input_size, output_size),
        minval=-bound, maxval=bound, dtype=jnp.float32)
    bias = jnp.zeros((channel_size, 1, output_size), dtype=jnp.float32)
    return weight, bias


if __name__ == "__main__":
    # Small shapes consistent with the module's forward.
    channel_size = 4      # total number of weight tiles
    input_size = 32
    output_size = 16
    N = 8                 # samples per selected tile
    B = 2                 # number of selected channels (len(indices))

    key = jax.random.PRNGKey(0)
    k_w, k_x, k_b = jax.random.split(key, 3)

    weight, _ = init_params(k_w, channel_size, input_size, output_size)
    # Use a non-zero bias so the bias-add path is actually exercised
    # (the module itself zero-inits bias).
    bias = 0.1 * jax.random.normal(
        k_b, (channel_size, 1, output_size), dtype=jnp.float32)
    x = jax.random.normal(k_x, (B, N, input_size), dtype=jnp.float32)
    indices = jnp.array([2, 0], dtype=jnp.int32)

    # One-time preparation (hoisted out of the per-call path).
    w_prep, b_prep, out_size = prepare_params(weight, bias)

    out = adaptive_linear_forward(x, w_prep, b_prep, indices, out_size)
    out = jax.block_until_ready(out)

    # Pure-JAX full-precision reference: bmm(x, weight[indices]) + bias[indices]
    ref = jnp.einsum("bni,bio->bno", x, weight[indices]) + bias[indices]
    assert out.shape == (B, N, output_size)
    # Loose tolerance vs. f32 reference (kernel uses bf16 compute, f32 accum).
    assert jnp.allclose(out, ref, atol=2e-2, rtol=2e-2), (
        float(jnp.max(jnp.abs(out - ref))))

    # Tighter check against a reference that applies the same bf16 rounding.
    ref_bf16 = jnp.einsum(
        "bni,bio->bno",
        x.astype(jnp.bfloat16), weight[indices].astype(jnp.bfloat16),
        preferred_element_type=jnp.float32) + bias[indices]
    assert jnp.allclose(out, ref_bf16, atol=1e-3, rtol=1e-3), (
        float(jnp.max(jnp.abs(out - ref_bf16))))

    # Full-precision path (compute_dtype=f32) for validation of the kernel
    # structure independent of bf16 rounding.
    w32, b32, out_size32 = prepare_params(weight, bias, compute_dtype=jnp.float32)
    out32 = jax.block_until_ready(
        adaptive_linear_forward(x, w32, b32, indices, out_size32))
    assert jnp.allclose(out32, ref, atol=1e-5, rtol=1e-5), (
        float(jnp.max(jnp.abs(out32 - ref))))

    print("KERNEL_OK")
</pallas_src>

<mosaic_0001>
module attributes {stable_mosaic.version = 11 : i64} {
  func.func @_adaptive_linear_kernel(%arg0: i32, %arg1: i32, %arg2: i32, %arg3: memref<2xi32, #tpu.memory_space<smem>>, %arg4: memref<1x8x32xf32, #tpu.memory_space<vmem>>, %arg5: memref<1x32x128xbf16, #tpu.memory_space<vmem>>, %arg6: memref<1x1x128xf32, #tpu.memory_space<vmem>>, %arg7: memref<1x8x128xf32, #tpu.memory_space<vmem>>) attributes {dimension_semantics = [#tpu.dimension_semantics<parallel>, #tpu.dimension_semantics<parallel>, #tpu.dimension_semantics<parallel>], iteration_bounds = array<i64: 2, 1, 1>, scalar_prefetch = 1 : i64, scratch_operands = 0 : i64, tpu.core_type = #tpu.core_type<tc>, window_params = [{transform_indices = @transform_0, window_bounds = array<i64: 1, 8, 32>}, {transform_indices = @transform_1, window_bounds = array<i64: 1, 32, 128>}, {transform_indices = @transform_2, window_bounds = array<i64: 1, 1, 128>}, {transform_indices = @transform_3, window_bounds = array<i64: 1, 8, 128>}]} {
    %c0 = arith.constant 0 : index
    %c0_0 = arith.constant 0 : index
    %c0_1 = arith.constant 0 : index
    %0 = vector.load %arg4[%c0, %c0_0, %c0_1] : memref<1x8x32xf32, #tpu.memory_space<vmem>>, vector<1x8x32xf32>
    %1 = vector.shape_cast %0 : vector<1x8x32xf32> to vector<8x32xf32>
    %2 = arith.truncf %1 : vector<8x32xf32> to vector<8x32xbf16>
    %c0_2 = arith.constant 0 : index
    %c0_3 = arith.constant 0 : index
    %c0_4 = arith.constant 0 : index
    %3 = vector.load %arg5[%c0_2, %c0_3, %c0_4] : memref<1x32x128xbf16, #tpu.memory_space<vmem>>, vector<1x32x128xbf16>
    %4 = vector.shape_cast %3 : vector<1x32x128xbf16> to vector<32x128xbf16>
    %cst = arith.constant dense<0.000000e+00> : vector<8x128xf32>
    %5 = tpu.matmul %2, %4, %cst {dimension_numbers = #tpu.dot_dimension_numbers<[1], [0], [0], [1], [0, 0, 1, 1], [], []>} : vector<8x32xbf16>, vector<32x128xbf16>, vector<8x128xf32> -> vector<8x128xf32>
    %c0_5 = arith.constant 0 : index
    %c0_6 = arith.constant 0 : index
    %c0_7 = arith.constant 0 : index
    %6 = vector.load %arg6[%c0_5, %c0_6, %c0_7] : memref<1x1x128xf32, #tpu.memory_space<vmem>>, vector<1x1x128xf32>
    %7 = vector.shape_cast %6 : vector<1x1x128xf32> to vector<1x128xf32>
    %8 = vector.broadcast %7 : vector<1x128xf32> to vector<8x128xf32>
    %9 = arith.addf %5, %8 : vector<8x128xf32>
    %c0_8 = arith.constant 0 : index
    %c0_9 = arith.constant 0 : index
    %c0_10 = arith.constant 0 : index
    %10 = vector.load %arg7[%c0_8, %c0_9, %c0_10] : memref<1x8x128xf32, #tpu.memory_space<vmem>>, vector<1x8x128xf32>
    %11 = vector.shape_cast %10 : vector<1x8x128xf32> to vector<8x128xf32>
    %12 = vector.shape_cast %9 : vector<8x128xf32> to vector<1x8x128xf32>
    tpu.vector_store %arg7[%c0_8, %c0_9, %c0_10], %12 {strides = array<i32>} : memref<1x8x128xf32, #tpu.memory_space<vmem>>, vector<1x8x128xf32>,
    return
  }
  func.func @transform_0(%arg0: i32, %arg1: i32, %arg2: i32, %arg3: memref<2xi32, #tpu.memory_space<smem>>) -> (i32, i32, i32) {
    %c0_i32 = arith.constant 0 : i32
    %c0_i32_0 = arith.constant 0 : i32
    return %arg0, %arg2, %c0_i32 : i32, i32, i32
  }
  func.func @transform_1(%arg0: i32, %arg1: i32, %arg2: i32, %arg3: memref<2xi32, #tpu.memory_space<smem>>) -> (i32, i32, i32) {
    %0 = arith.index_cast %arg0 : i32 to index
    %1 = memref.load %arg3[%0] : memref<2xi32, #tpu.memory_space<smem>>
    %c0_i32 = arith.constant 0 : i32
    %c0_i32_0 = arith.constant 0 : i32
    return %1, %c0_i32, %arg1 : i32, i32, i32
  }
  func.func @transform_2(%arg0: i32, %arg1: i32, %arg2: i32, %arg3: memref<2xi32, #tpu.memory_space<smem>>) -> (i32, i32, i32) {
    %0 = arith.index_cast %arg0 : i32 to index
    %1 = memref.load %arg3[%0] : memref<2xi32, #tpu.memory_space<smem>>
    %c0_i32 = arith.constant 0 : i32
    %c0_i32_0 = arith.constant 0 : i32
    return %1, %c0_i32, %arg1 : i32, i32, i32
  }
  func.func @transform_3(%arg0: i32, %arg1: i32, %arg2: i32, %arg3: memref<2xi32, #tpu.memory_space<smem>>) -> (i32, i32, i32) {
    %c0_i32 = arith.constant 0 : i32
    return %arg0, %arg2, %arg1 : i32, i32, i32
  }
}

</mosaic_0001>

<bundles_post_ra>
// kernel: adaptive_linear_forward.1
= control target key start
LH: loop header
LB: loop body
LE: loop exit
PB: predicated region body
PF: predicated region fallthrough
CT: control target
= control target key end

     0   :  { %s1175_s0 = inlined_call_operand.vmem [shape: s32[2], index: 0, kind: input, shape index: {}]   ;;  %s1176_s1 = inlined_call_operand.hbm [shape: f32[2,8,32], index: 1, kind: input, shape index: {}]   ;;  %s1177_s2 = inlined_call_operand.hbm [shape: bf16[4,32,128], index: 2, kind: input, shape index: {}]   ;;  %s1178_s3 = inlined_call_operand.vmem [shape: f32[4,1,128], index: 3, kind: input, shape index: {}]   ;;  %s1179_s4 = inlined_call_operand.hbm [shape: f32[2,8,128], index: 4, kind: output, shape index: {}]  }
   0x1   :  { %1185 = sst [smem:[#allocation18_spill]] %s1176_s1  ;;  %s9_s17 = sshll.u32 %s1175_s0, 4  ;;  %s10_s17 = int_to_ptr.vmem [resolvable:$true] %s9_s17 }
   0x2   :  { %s641_s18 = scalar_lea.vmem %s10_s17, 16  ;;  %p646_p1 = scmp.lt.s32.totalorder %s10_s17, %s10_s17 }
   0x3   :  { %p642_p0 = scmp.ne.s32.totalorder %s10_s17, %s641_s18  ;;  %p647_p2 = scmp.lt.s32.totalorder %s641_s18, %s641_s18 }
   0x5   :  { %p648_p3 = por %p647_p2, %p646_p1 }
   0x7   :  { %p649_p4 = pnand %p648_p3, %p642_p0 }
   0x9   :  { %652 = shalt.err (!%p649_p4)  }
   0xa   :  { %s827_s19 = smov [#allocation3]  }
   0xb   :  { %12 = dma.vmem_to_smem %s10_s17, 16, %s827_s19, [#allocation2] }
   0xc   :  { %777 = dma.done.wait [#allocation2], 16 }
   0xd   :  { %778 = vsyncadd [#allocation2], 4294967280 }
   0xe   :  { %14 = sfence }
   0xf   :  { %15 = vsyncpa [#allocation5], 0 }
  0x10   :  { %17 = vsyncpa [#allocation5 + $0x1], 0 }
  0x11   :  { %18 = vsyncpa [#allocation8], 0 }
  0x12   :  { %20 = vsyncpa [#allocation8 + $0x1], 0 }
  0x13   :  { %21 = vsyncpa [#allocation6], 0 }
  0x14   :  { %23 = vsyncpa [#allocation6 + $0x1], 0  ;;  %s863_s0 = smov 0   ;;  %s865_s20 = smov 0  }
  0x15   :  { %s867_s21 = smov 0   ;;  %s869_s22 = smov 0  }
  0x16   :  { %s871_s23 = smov 0   ;;  %s873_s24 = smov 0  }
  0x17   :  { %s875_s25 = smov 0   ;;  %s877_s26 = smov 0  }
  0x18   :  { %s879_s27 = smov 0  }
  0x19 LB: > { %s506_s28 = sadd.s32 4294967295, %s825_s27   ;;  %s507_s29 = sadd.s32 4294967294, %s825_s27   ;;  %s825_s27 = sphi %s879_s27, %s29_s27   ;;  %s821_s26 = sphi %s877_s26, %s1218_s26   ;;  %s817_s25 = sphi %s875_s25, %s1217_s25   ;;  %s813_s24 = sphi %s873_s24, %s1216_s24   ;;  %s809_s23 = sphi %s871_s23, %s1215_s23   ;;  %s805_s22 = sphi %s869_s22, %s1214_s22   ;;  %s801_s21 = sphi %s867_s21, %s1213_s21   ;;  %s797_s20 = sphi %s865_s20, %s1212_s20   ;;  %s793_s0 = sphi %s863_s0, %s1211_s0  }
  0x1a   : > { %s48_s30 = sadd.s32 1, %s821_s26  ;;  %s57_s5 = sadd.s32 1, %s813_s24 }
  0x1b   : > { %p50_p5 = scmp.ge.s32.totalorder %s48_s30, 2  ;;  %p64_p6 = scmp.ne.s32.totalorder %s813_s24, %s809_s23 }
  0x1c   : > { %p65_p7 = scmp.eq.s32.totalorder %s825_s27, 0  ;;  %p70_p8 = scmp.ne.s32.totalorder %s809_s23, %s805_s22 }
  0x1d   : > { %s1220_s30 = smov (%p50_p5, %s48_s30), 0  ;;  %p928_p10 = scmp.eq.s32.totalorder %s506_s28, 0 }
  0x1e   : > { %1186 = sst [smem:[#allocation16_spill]] %s1220_s30  ;;  %p924_p9 = por %p65_p7, %p64_p6 }
  0x1f   : > { %s52_s8 = ssub.s32 %s821_s26, %s1220_s30  ;;  %s80_s9 = sld [smem:[#allocation3 + %s821_s26]] }
  0x20   : > { %p55_p11 = scmp.eq.s32.totalorder %s52_s8, 0  ;;  %p940_p12 = por %p928_p10, %p70_p8 }
  0x21   : > { %s81_s11 = sld [smem:[#allocation3 + %s1220_s30]]  ;;  %s87_s12 = sadd.s32 1, %s801_s21 }
  0x22   : > { %s1189_s10 = scalar_select %p940_p12, 1, 0 }
  0x23   : > { %s947_s13 = scalar_select %p55_p11, %s813_s24, %s57_s5  }
  0x24   : > { %p94_p13 = scmp.ne.s32.totalorder %s801_s21, %s797_s20  ;;  %p100_p0 = scmp.ne.s32.totalorder %s797_s20, %s793_s0 }
  0x25   : > { %1190 = sst [smem:[#allocation17_spill]] %s947_s13  ;;  %p158_p1 = scmp.eq.s32.totalorder %s506_s28, 1 }
  0x26   : > { %p164_p2 = scmp.eq.s32.totalorder %s507_s29, 1  ;;  %p955_p3 = por %p94_p13, %p65_p7 }
  0x27   : > { %p961_p4 = por %p100_p0, %p928_p10  ;;  %p968_p5 = por %p158_p1, %p64_p6 }
  0x28   : > { %p975_p11 = por %p164_p2, %p70_p8  ;;  %s82_s18 = ssub.s32 %s80_s9, %s81_s11 }
  0x29   : > { %s1192_s15 = scalar_select %p961_p4, 1, 0 }
  0x2a   : > { %s1193_s16 = scalar_select %p968_p5, 1, 0 }
  0x2b   : > { %s1194_s17 = scalar_select %p975_p11, 1, 0 }
  0x2c   : > { %p85_p13 = scmp.eq.s32.totalorder %s82_s18, 0  ;;  %p1182_p12 = scmp.lt.s32.totalorder %s825_s27, 2 }
  0x2d   : > { %s184_s19 = sand.u32 1, %s813_s24   ;;  %s511_s0 = sshll.u32 %s821_s26, 7 }
  0x2e   : > { %s984_s28 = scalar_select %p85_p13, %s801_s21, %s87_s12  }
  0x2f   : > { %s510_s29 = sshll.u32 %s184_s19, 3  ;;  %s1195_s1 = sld [smem:[#allocation18_spill]] }
  0x30   : > { %s188_s30 = scalar_lea.vmem [#allocation4], %s510_s29  ;;  %p995_p6 = pnand %p1182_p12, %p924_p9 }
  0x31   : > { %s196_s13 = sshll.u32 %s188_s30, 4  ;;  %s185_s11 = scalar_lea.sflag [#allocation5], %s184_s19  ;;  %s999_s13 = int_to_ptr.vmem [resolvable:$true] %s196_s13 }
  0x32   : > { %p655_p1 = pneg %p995_p6 }
  0x35   : > { %s989_s8 = scalar_lea.hbm %s1195_s1, %s511_s0  ;;  %s658_s18 = scalar_lea.hbm %s1195_s1, 256 }
  0x36   : > { %s653_s12 = scalar_lea.hbm %s989_s8, 128  ;;  %p659_p9 = scmp.lt.u32.totalorder %s989_s8, %s1195_s1 }
  0x37   : > { %p654_p0 = scmp.ne.s32.totalorder %s989_s8, %s653_s12  ;;  %p660_p7 = scmp.lt.u32.totalorder %s658_s18, %s653_s12 }
  0x38   : > { %p662_p8 = scmp.lt.u32.totalorder %s653_s12, %s989_s8 }
  0x39   : > { %p656_p2 = pnand %p655_p1, %p654_p0  ;;  %p661_p12 = por %p660_p7, %p659_p9 }
  0x3b   : > { %p657_p13 = pneg %p656_p2  ;;  %p663_p10 = por %p662_p8, %p661_p12 }
  0x3d   : > { %p664_p11 = pnand %p663_p10, %p657_p13 }
  0x3f   : > { %667 = shalt.err (!%p664_p11)
}
  0x40   : > { %s668_s19 = scalar_lea.vmem %s999_s13, 128  ;;  %s828_s5 = smov [#allocation4]  }
  0x41   : > { %p669_p0 = scmp.ne.s32.totalorder %s999_s13, %s668_s19  ;;  %s673_s7 = sshll.u32 %s828_s5, 4  ;;  %s674_s7 = int_to_ptr.vmem [resolvable:$false] %s673_s7 }
  0x42   : > { %s675_s30 = scalar_lea.vmem %s674_s7, 256  ;;  %p676_p4 = scmp.lt.s32.totalorder %s999_s13, %s674_s7 }
  0x43   : > { %p671_p2 = pnand %p669_p0, %p655_p1  ;;  %p677_p7 = scmp.lt.s32.totalorder %s675_s30, %s668_s19 }
  0x45   : > { %p672_p5 = pneg %p671_p2  ;;  %p678_p9 = por %p677_p7, %p676_p4 }
  0x47   : > { %p679_p12 = pnand %p678_p9, %p672_p5 }
  0x49   : > { %682 = shalt.err (!%p679_p12)
}
  0x4a   : > { %550 = dma.hbm_to_vmem [thread:$0]  (!%p995_p6), %s989_s8, 128, %s999_s13, %s185_s11  }
  0x4b   : > { %p1197_p11 = scmp.lt.s32.totalorder %s825_s27, 3  ;;  %p1198_p8 = scmp.ge.s32.totalorder %s825_s27, 1 }
  0x4c   : > { %s203_s9 = sand.u32 1, %s801_s21   ;;  %p1200_p5 = scmp.lt.s32.totalorder %s825_s27, 2 }
  0x4d   : > { %p1032_p4 = pnand %p1198_p8, %p1197_p11  ;;  %s512_s6 = sshll.u32 %s203_s9, 4 }
  0x4e   : > { %p1041_p10 = pnand %p1200_p5, %p955_p3  ;;  %p1202_p6 = pmov %p1200_p5 }
  0x4f   : > { %s540_s0 = scalar_select %p955_p3, [#allocation3], [#allocation10] }
  0x50   : > { %s541_s13 = scalar_select %p955_p3, %s821_s26, 0 }
  0x51   : > { %s1222_s0 = smov (!%p1202_p6, %s540_s0), [#allocation11]  ;;  %p1203_p1 = pmov %p1200_p5 }
  0x52   : > { %s207_s11 = scalar_lea.vmem [#allocation7], %s512_s6  ;;  %s1061_s14 = scalar_lea.sflag [#allocation8], %s203_s9 }
  0x53   : > { %s1224_s13 = smov (!%p1203_p1, %s541_s13), 0  ;;  %s216_s29 = sshll.u32 %s207_s11, 4  ;;  %s1054_s29 = int_to_ptr.vmem [resolvable:$true] %s216_s29 }
  0x54   : > { %s208_s8 = sld [smem:[%s1222_s0 + %s1224_s13]]  ;;  %p685_p13 = pneg %p1041_p10 }
  0x55   : > { %s688_s13 = scalar_lea.hbm %s1177_s2, 1024 }
  0x5a   : > { %s527_s19 = sshll.u32 %s208_s8, 8 }
  0x5b   : > { %s1059_s30 = scalar_lea.hbm %s1177_s2, %s527_s19 }
  0x5c   : > { %s683_s1 = scalar_lea.hbm %s1059_s30, 256  ;;  %p689_p7 = scmp.lt.u32.totalorder %s1059_s30, %s1177_s2 }
  0x5d   : > { %p684_p3 = scmp.ne.s32.totalorder %s1059_s30, %s683_s1  ;;  %p690_p9 = scmp.lt.u32.totalorder %s688_s13, %s683_s1 }
  0x5e   : > { %p692_p11 = scmp.lt.u32.totalorder %s683_s1, %s1059_s30 }
  0x5f   : > { %p686_p0 = pnand %p685_p13, %p684_p3  ;;  %p691_p12 = por %p690_p9, %p689_p7 }
  0x61   : > { %p687_p2 = pneg %p686_p0  ;;  %p693_p8 = por %p692_p11, %p691_p12 }
  0x63   : > { %p694_p5 = pnand %p693_p8, %p687_p2 }
  0x65   : > { %697 = shalt.err (!%p694_p5)
}
  0x66   : > { %s698_s9 = scalar_lea.vmem %s1054_s29, 256  ;;  %s829_s19 = smov [#allocation7]  }
  0x67   : > { %p699_p6 = scmp.ne.s32.totalorder %s1054_s29, %s698_s9  ;;  %s703_s5 = sshll.u32 %s829_s19, 4  ;;  %s704_s5 = int_to_ptr.vmem [resolvable:$false] %s703_s5 }
  0x68   : > { %s705_s7 = scalar_lea.vmem %s704_s5, 512  ;;  %p706_p0 = scmp.lt.s32.totalorder %s1054_s29, %s704_s5 }
  0x69   : > { %p701_p1 = pnand %p699_p6, %p685_p13  ;;  %p707_p7 = scmp.lt.s32.totalorder %s705_s7, %s698_s9 }
  0x6b   : > { %p702_p3 = pneg %p701_p1  ;;  %p708_p9 = por %p707_p7, %p706_p0 }
  0x6d   : > { %p709_p12 = pnand %p708_p9, %p702_p3 }
  0x6f   : > { %712 = shalt.err (!%p709_p12)
}
  0x70   : > { %s830_s1 = smov 64   ;;  %s831_s6 = smov 4  }
  0x71   : > { %555 = dma.hbm_to_vmem [thread:$0]  (!%p1041_p10), %s1059_s30, 256, %s1054_s29, %s1061_s14, %s830_s1, %s830_s1, %s831_s6  }
  0x72   : > { %239 = sbr.rel (%p1032_p4) target bundleno = 363 (0x16b), region = 32  ;;  %s1092_s0 = sand.u32 (!%p1032_p4), 1, %s809_s23  }
  0x73   : > { %s516_s13 = sshll.u32 (!%p1032_p4), %s1092_s0, 3  ;;  %s242_s8 = scalar_lea.sflag (!%p1032_p4), [#allocation5], %s1092_s0 }
  0x74   : > { %s245_s11 = scalar_lea.vmem (!%p1032_p4), [#allocation4], %s516_s13  ;;  %p1204_p13 = scmp.ne.s32.totalorder (!%p1032_p4), %s1189_s10, 0 }
  0x79   : > { %780 = dma.done.wait (%p1204_p13), %s242_s8, 128  }
  0x7a   : > { %782 = vsyncadd (%p1204_p13), %s242_s8, 4294967168  ;;  %s250_s12 = sand.u32 1, %s797_s20   ;;  %p1205_p4 = scmp.ne.s32.totalorder %s1192_s15, 0 }
  0x7b   : > { %s517_s18 = sshll.u32 %s250_s12, 4  ;;  %s251_s29 = scalar_lea.sflag [#allocation8], %s250_s12 }
  0x7c   : > { %s254_s30 = scalar_lea.vmem [#allocation7], %s517_s18 }
  0x7d   : > { %784 = dma.done.wait (%p1205_p4), %s251_s29, 256  }
  0x7e   : > { %786 = vsyncadd (%p1205_p4), %s251_s29, 4294967040  ;;  %v832_v0 = vmov 0.0   ;;  %vm833_vm0 = vmmov 0   ;;  %v639_v1 = vld [vmem:[%s254_s30] sm:$0xff]   ;;  %v640_v2 = vld [vmem:[%s254_s30 + $0x8] sm:$0xff]   ;;  %vm324_vm1 = vcmask 261120  }
  0x7f   : > { %531 = vmatprep.subr.bf16.mxu0 %v832_v0  ;;  %535 = vmatprep.mubr.msk.bf16.mxu0 %vm833_vm0, %v832_v0  ;;  %v299_v3 = vld [vmem:[%s245_s11] sm:$0xff]  ;;  %s290_s10 = sld [smem:[#allocation3 + %s817_s25]]  ;;  %s524_s19 = sshll.u32 %s817_s25, 7 }
  0x80   : > { %532 = vmatpush3.bf16.msra.mxu0 %v639_v1  ;;  %v300_v4 = vpack.c.bf16 %v299_v3, %v299_v3  ;;  %s288_s5 = scalar_lea.vmem [#allocation9], %s516_s13  ;;  %s1117_s8 = scalar_lea.hbm %s1179_s4, %s524_s19 }
  0x81   : > { %533 = vmatprep.subr.bf16.mxu0 %v832_v0  ;;  %s385_s7 = sshll.u32 %s288_s5, 4  ;;  %s370_s25 = scalar_lea.sflag [#allocation6], %s1092_s0  ;;  %s1119_s7 = int_to_ptr.vmem [resolvable:$true] %s385_s7 }
  0x82   : > { %s713_s11 = scalar_lea.vmem %s1119_s7, 128  ;;  %p1206_p11 = scmp.ne.s32.totalorder %s1193_s16, 0 }
  0x83   : > { %p714_p2 = scmp.ne.s32.totalorder %s1119_s7, %s713_s11  ;;  %s834_s13 = smov [#allocation9]  }
  0x84   : > { %534 = vmatpush3.bf16.msra.mxu0 %v640_v2  ;;  %s717_s12 = sshll.u32 %s834_s13, 4  ;;  %s718_s12 = int_to_ptr.vmem [resolvable:$false] %s717_s12 }
  0x85   : > { %p291_p10 = scmp.lt.s32.totalorder %s290_s10, 3  ;;  %p715_p8 = pnand %p714_p2, %p1206_p11 }
  0x86   : > { %s719_s18 = scalar_lea.vmem %s718_s12, 256  ;;  %p720_p6 = scmp.lt.s32.totalorder %s1119_s7, %s718_s12 }
  0x87   : > { %536 = vmatmul.mubr.msk.bf16.vlgmr.msra.gmra.mrb[0].mxu0 %vm324_vm1, %v300_v4  ;;  %s1226_s10 = smov (!%p291_p10, %s290_s10), 3  ;;  %p716_p5 = pneg %p715_p8 }
  0x88   : > { %s296_s9 = scalar_lea.vmem %s1178_s3, %s1226_s10  ;;  %p721_p1 = scmp.lt.s32.totalorder %s719_s18, %s713_s11 }
  0x89   : > { %v519_v5 = vld [vmem:[%s296_s9] ss:$0 sm:$0xff] }
  0x8a   : > { %p722_p3 = por %p721_p1, %p720_p6 }
  0x8c   : > { %p723_p0 = pnand %p722_p3, %p716_p5 }
 0x15a   : > { %v362_v6 = vpop.f32.mrb[0].mxu0 }
 0x15b   : > { %v363_v7 = vadd.f32 %v519_v5, %v362_v6  ;;  %v537_v8 = vpop.f32.mrb[1].mxu0 }
 0x15c   : > { %v365_v9 = vpop.f32.mrb[2].mxu0 }
 0x15d   : > { %368 = vst [vmem:[%s288_s5] sm:$0xff] %v363_v7  ;;  %v538_v10 = vpop.f32.mrb[3].mxu0 }
 0x15e   : > { %726 = shalt.err (!%p723_p0)
}
 0x15f   : > { %s727_s0 = scalar_lea.hbm %s1117_s8, 128  ;;  %s731_s10 = scalar_lea.hbm %s1179_s4, 256 }
 0x160   : > { %p728_p7 = scmp.ne.s32.totalorder %s1117_s8, %s727_s0  ;;  %p732_p13 = scmp.lt.u32.totalorder %s1117_s8, %s1179_s4 }
 0x161   : > { %p733_p4 = scmp.lt.u32.totalorder %s731_s10, %s727_s0  ;;  %p735_p2 = scmp.lt.u32.totalorder %s727_s0, %s1117_s8 }
 0x162   : > { %p729_p9 = pnand %p728_p7, %p1206_p11 }
 0x163   : > { %p734_p10 = por %p733_p4, %p732_p13 }
 0x164   : > { %p730_p12 = pneg %p729_p9 }
 0x165   : > { %p736_p8 = por %p735_p2, %p734_p10 }
 0x167   : > { %p737_p5 = pnand %p736_p8, %p730_p12 }
 0x169   : > { %740 = shalt.err (!%p737_p5)
}
 0x16a   : > { %545 = dma.vmem_to_hbm [thread:$0]  (%p1206_p11), %s1119_s7, 128, %s1117_s8, %s370_s25  }
 0x16b PF: > { %s397_s9 = sand.u32 1, %s805_s22   ;;  %p1207_p6 = scmp.ne.s32.totalorder %s1194_s17, 0 }
 0x16c   : > { %p1208_p1 = scmp.ge.s32.totalorder %s825_s27, 2  ;;  %s398_s19 = scalar_lea.sflag [#allocation6], %s397_s9 }
 0x16e   : > { %p557_p3 = pnand %p1208_p1, %p1207_p6 }
 0x170   : > { %788 = dma.done.wait (!%p557_p3), %s398_s19, 128  }
 0x171   : > { %790 = vsyncadd (!%p557_p3), %s398_s19, 4294967168  ;;  %s29_s27 = sadd.s32 1, %s825_s27   ;;  %s1209_s16 = sld [smem:[#allocation17_spill]] }
 0x172   : > { %p26_p0 = scmp.ge.s32.totalorder %s29_s27, 4   ;;  %s1210_s5 = sld [smem:[#allocation16_spill]] }
 0x173   : > { %s1211_s0 = smov %s797_s20  ;;  %s1212_s20 = smov %s801_s21 }
 0x174   : > { %s1213_s21 = smov %s984_s28  ;;  %s1214_s22 = smov %s809_s23 }
 0x175   : > { %s1215_s23 = smov %s813_s24  ;;  %s1217_s25 = smov %s821_s26 }
 0x176   :  { %28 = sbr.rel (!%p26_p0) target bundleno = 25 (0x19), region = 93 }
 0x177   : > { %s1216_s24 = smov %s1209_s16 }
 0x178   : > { %s1218_s26 = smov %s1210_s5 }
 0x17d   :  { %403 = vsyncpa [#allocation5], 1 }
 0x17e   :  { %405 = vsyncpa [#allocation5 + $0x1], 1 }
 0x17f   :  { %406 = vsyncpa [#allocation8], 1 }
 0x180   :  { %408 = vsyncpa [#allocation8 + $0x1], 1 }
 0x181   :  { %409 = vsyncpa [#allocation6], 1 }
 0x182   :  { %411 = vsyncpa [#allocation6 + $0x1], 1 }

</bundles_post_ra>
